<compile_context>
chip_gen: v6e
topology: v6e:2x2x1
jax: 0.10.0
libtpu: 0.0.40
codegen_flags: <defaults>
</compile_context>

<pallas_src>
import jax
import jax.numpy as jnp
from jax.experimental import pallas as pl
from jax.experimental.pallas import tpu as pltpu

VALUES = (0, 85, 170, 255)   # the 4 pixel-value keyed domain embedding tables
NUM_VALUES = len(VALUES)
_MAX_BM = 4096               # cap on batch rows per grid step (lane axis)


def _round_up(x, m):
    return (x + m - 1) // m * m


def _split3_to_bf16(x):
    """Decompose f32 `x` into (hi, mid, lo) bf16 terms with hi+mid+lo ~= x
    (residual ~2^-24 relative).  Lets the one-hot gather run as a single-pass
    bf16 MXU matmul with f32 accumulation while staying numerically faithful
    to the f32 tables (drop `lo` for a cheaper 2-pass variant if ~1e-4
    relative accuracy suffices)."""
    x = x.astype(jnp.float32)
    hi = x.astype(jnp.bfloat16)
    r1 = x - hi.astype(jnp.float32)
    mid = r1.astype(jnp.bfloat16)
    lo = (r1 - mid.astype(jnp.float32)).astype(jnp.bfloat16)
    return hi, mid, lo


def efe_kernel(idx_ref, ctx_ref, dom_ref, out_ref):
    # idx_ref: (2, bm) int32        row 0: bgc indices, row 1: domain indices
    # ctx_ref: (D, 3*num_bgcs) bf16 [hi | mid | lo] split of context_table.T
    # dom_ref: (4*D, 3*num_domains) bf16, [hi|mid|lo] split of stacked,
    #          transposed domain tables (value-major on sublanes)
    # out_ref: (4, bm)              lane-dense logits (batch on the lane axis)
    D = ctx_ref.shape[0]
    num_bgcs = ctx_ref.shape[1] // 3
    num_domains = dom_ref.shape[1] // 3
    bm = out_ref.shape[1]

    bgc = idx_ref[0:1, :]                                   # (1, bm)
    dom = idx_ref[1:2, :]                                   # (1, bm)

    # One shared iota, cast one-hots straight to bf16 (matches table dtype).
    n_max = max(num_bgcs, num_domains)
    row = jax.lax.broadcasted_iota(jnp.int32, (n_max, bm), 0)
    ctx_oh = (row[:num_bgcs] == bgc).astype(ctx_ref.dtype)  # (num_bgcs, bm)
    dom_oh = (row[:num_domains] == dom).astype(dom_ref.dtype)

    # Replicate along the contraction axis to match the hi/mid/lo K-stacking,
    # so each gather is exactly ONE single-pass bf16 MXU matmul (f32 acc).
    ctx_oh3 = jnp.concatenate([ctx_oh, ctx_oh, ctx_oh], axis=0)   # (3N, bm)
    dom_oh3 = jnp.concatenate([dom_oh, dom_oh, dom_oh], axis=0)   # (3M, bm)

    c = jnp.dot(ctx_ref[...], ctx_oh3,
                preferred_element_type=jnp.float32)               # (D, bm)
    eta = jnp.dot(dom_ref[...], dom_oh3,
                  preferred_element_type=jnp.float32)             # (4D, bm)

    # Single fused D-reduction for all 4 values (VPU mul + one sublane reduce
    # per value group); batch stays on lanes end-to-end.
    eta = eta.reshape(NUM_VALUES, D, bm)
    out_ref[...] = jnp.sum(eta * c[None, :, :], axis=1).astype(out_ref.dtype)


def efe_forward(bgc_idx, domain_idx, context_table, domain_tables, *, bm=None):
    """Pallas implementation of EFEModule.forward.

    bgc_idx:       (B,) int   indices into context_table        (must be in range)
    domain_idx:    (B,) int   indices into each domain table    (must be in range)
    context_table: (num_bgcs, D) float
    domain_tables: (4, num_domains, D) float (stacked for values 0,85,170,255)
    returns:       (B, 4) logits
    """
    bgc_idx = bgc_idx.astype(jnp.int32)       # mirrors .long() cast in PyTorch
    domain_idx = domain_idx.astype(jnp.int32)

    B = bgc_idx.shape[0]
    num_bgcs, D = context_table.shape
    num_domains = domain_tables.shape[1]
    out_dtype = context_table.dtype

    # --- batch tiling --------------------------------------------------------
    # Lane-dense tiles (multiple of 128), up to _MAX_BM rows per grid step.
    # The step count is kept EVEN so both v7x TensorCores get work via
    # dimension_semantics=("parallel",); the extra (mostly padding) step on
    # single-TC v5e/v6e costs ~1 us and is negligible.
    if bm is None:
        B128 = _round_up(max(B, 1), 128)
        nsteps = max(2, pl.cdiv(B128, _MAX_BM))
        if nsteps % 2:
            nsteps += 1
        bm = _round_up(pl.cdiv(B128, nsteps), 128)
        B_pad = nsteps * bm
    else:
        assert bm % 128 == 0 and bm > 0
        B_pad = _round_up(max(B, 1), bm)
        nsteps = B_pad // bm

    # Pad the batch; padded rows use index 0 (a valid row -> no OOB reads) and
    # are sliced off the output.  Pack both index vectors into one array so
    # each grid step does a single small index DMA.
    pad = B_pad - B
    if pad:
        bgc_idx = jnp.pad(bgc_idx, (0, pad))
        domain_idx = jnp.pad(domain_idx, (0, pad))
    idx = jnp.stack([bgc_idx, domain_idx], axis=0)            # (2, B_pad)

    # --- one-time table layout / precision prep (batch-independent) ----------
    # Embedding dim on sublanes, table rows on lanes; the 4 domain tables are
    # stacked along the sublane axis so the kernel does ONE fused matmul.
    ctx_t = context_table.T                                   # (D, num_bgcs)
    dom_t = jnp.transpose(domain_tables, (0, 2, 1)).reshape(
        NUM_VALUES * D, num_domains)                          # (4D, num_domains)
    ctx_split = jnp.concatenate(_split3_to_bf16(ctx_t), axis=1)   # (D, 3*num_bgcs)
    dom_split = jnp.concatenate(_split3_to_bf16(dom_t), axis=1)   # (4D, 3*num_domains)

    # --- VMEM budget derived from the actual footprint (review item) ---------
    bytes_per_col = (
        2 * 2 * 4                               # (2, bm) int32 idx block, x2 buffers
        + 2 * NUM_VALUES * 4                    # (4, bm) f32 out block, x2 buffers
        + 3 * (num_bgcs + num_domains) * 2      # bf16 one-hots
        + (1 + 2 * NUM_VALUES) * D * 4          # c, eta, eta*c f32 intermediates
    )
    table_bytes = 2 * 2 * 3 * D * (num_bgcs + NUM_VALUES * num_domains)
    vmem_limit = int(min(64 << 20,
                         max(8 << 20, 3 * (bm * bytes_per_col + table_bytes))))

    grid = (nsteps,)
    out_t = pl.pallas_call(
        efe_kernel,
        out_shape=jax.ShapeDtypeStruct((NUM_VALUES, B_pad), out_dtype),
        grid_spec=pltpu.PrefetchScalarGridSpec(
            num_scalar_prefetch=0,
            grid=grid,
            in_specs=[
                pl.BlockSpec((2, bm), lambda i: (0, i)),
                # Tables fully VMEM-resident (constant block index -> fetched
                # once, not re-DMA'd per grid step).
                pl.BlockSpec((D, 3 * num_bgcs), lambda i: (0, 0)),
                pl.BlockSpec((NUM_VALUES * D, 3 * num_domains), lambda i: (0, 0)),
            ],
            out_specs=pl.BlockSpec((NUM_VALUES, bm), lambda i: (0, i)),
        ),
        compiler_params=pltpu.CompilerParams(
            dimension_semantics=("parallel",),
            vmem_limit_bytes=vmem_limit,
        ),
    )(idx, ctx_split, dom_split)

    # Lane-dense (4, B_pad) slab -> (B, 4) to match the PyTorch layout (slice
    # first so the transpose only touches the real batch).
    return out_t[:, :B].T


if __name__ == "__main__":
    # Small, deterministic configuration consistent with the module's __init__.
    num_bgcs = 16
    num_domains = 32
    embedding_dim = 32
    batch = 8

    key = jax.random.PRNGKey(0)
    k_ctx, k_dom, k_bgc, k_didx = jax.random.split(key, 4)

    # nn.Embedding default init is N(0, 1).
    context_table = jax.random.normal(
        k_ctx, (num_bgcs, embedding_dim), dtype=jnp.float32)
    domain_tables = jax.random.normal(
        k_dom, (NUM_VALUES, num_domains, embedding_dim), dtype=jnp.float32)

    bgc_idx = jax.random.randint(k_bgc, (batch,), 0, num_bgcs, dtype=jnp.int32)
    domain_idx = jax.random.randint(
        k_didx, (batch,), 0, num_domains, dtype=jnp.int32)

    out = efe_forward(bgc_idx, domain_idx, context_table, domain_tables)
    out = jax.block_until_ready(out)

    # Pure-JAX f32 reference of the forward semantics.  The hi/mid/lo bf16
    # split keeps the kernel within ~1e-6 of this; tolerance has headroom.
    c_ref = context_table[bgc_idx]                                  # (B, D)
    eta_ref = domain_tables[:, domain_idx, :]                       # (4, B, D)
    ref = jnp.sum(c_ref[None, :, :] * eta_ref, axis=-1).T           # (B, 4)

    assert out.shape == (batch, NUM_VALUES)
    assert jnp.allclose(out, ref, atol=1e-4, rtol=1e-4), \
        float(jnp.max(jnp.abs(out - ref)))

    print("KERNEL_OK")
</pallas_src>

<mosaic_0001>
module attributes {stable_mosaic.version = 11 : i64} {
  func.func @efe_kernel(%arg0: i32, %arg1: memref<2x128xi32, #tpu.memory_space<vmem>>, %arg2: memref<32x48xbf16, #tpu.memory_space<vmem>>, %arg3: memref<128x96xbf16, #tpu.memory_space<vmem>>, %arg4: memref<4x128xf32, #tpu.memory_space<vmem>>) attributes {dimension_semantics = [#tpu.dimension_semantics<parallel>], iteration_bounds = array<i64: 2>, scalar_prefetch = 0 : i64, scratch_operands = 0 : i64, tpu.core_type = #tpu.core_type<tc>, window_params = [{transform_indices = @transform_0, window_bounds = array<i64: 2, 128>}, {pipeline_mode = #tpu.pipeline_mode<synchronous>, transform_indices = @transform_1, window_bounds = array<i64: 32, 48>}, {pipeline_mode = #tpu.pipeline_mode<synchronous>, transform_indices = @transform_2, window_bounds = array<i64: 128, 96>}, {transform_indices = @transform_3, window_bounds = array<i64: 4, 128>}]} {
    %c0 = arith.constant 0 : index
    %c0_0 = arith.constant 0 : index
    %0 = vector.load %arg1[%c0, %c0_0] : memref<2x128xi32, #tpu.memory_space<vmem>>, vector<1x128xi32>
    %c1 = arith.constant 1 : index
    %c0_1 = arith.constant 0 : index
    %1 = vector.load %arg1[%c1, %c0_1] : memref<2x128xi32, #tpu.memory_space<vmem>>, vector<1x128xi32>
    %2 = tpu.iota {dimensions = array<i32: 0>} : vector<32x128xi32>
    %3 = vector.extract_strided_slice %2 {offsets = [0, 0], sizes = [16, 128], strides = [1, 1]} : vector<32x128xi32> to vector<16x128xi32>
    %4 = vector.broadcast %0 : vector<1x128xi32> to vector<16x128xi32>
    %5 = arith.cmpi eq, %3, %4 : vector<16x128xi32>
    %6 = arith.extui %5 : vector<16x128xi1> to vector<16x128xi32>
    %7 = arith.sitofp %6 : vector<16x128xi32> to vector<16x128xf32>
    %8 = arith.truncf %7 : vector<16x128xf32> to vector<16x128xbf16>
    %9 = vector.broadcast %1 : vector<1x128xi32> to vector<32x128xi32>
    %10 = arith.cmpi eq, %2, %9 : vector<32x128xi32>
    %11 = arith.extui %10 : vector<32x128xi1> to vector<32x128xi32>
    %12 = arith.sitofp %11 : vector<32x128xi32> to vector<32x128xf32>
    %13 = arith.truncf %12 : vector<32x128xf32> to vector<32x128xbf16>
    %14 = tpu.concatenate %8, %8, %8 in 0 : vector<16x128xbf16>, vector<16x128xbf16>, vector<16x128xbf16> -> vector<48x128xbf16>
    %15 = tpu.concatenate %13, %13, %13 in 0 : vector<32x128xbf16>, vector<32x128xbf16>, vector<32x128xbf16> -> vector<96x128xbf16>
    %c0_2 = arith.constant 0 : index
    %c0_3 = arith.constant 0 : index
    %16 = vector.load %arg2[%c0_2, %c0_3] : memref<32x48xbf16, #tpu.memory_space<vmem>>, vector<32x48xbf16>
    %cst = arith.constant dense<0.000000e+00> : vector<32x128xf32>
    %17 = tpu.matmul %16, %14, %cst {dimension_numbers = #tpu.dot_dimension_numbers<[1], [0], [0], [1], [0, 0, 1, 1], [], []>} : vector<32x48xbf16>, vector<48x128xbf16>, vector<32x128xf32> -> vector<32x128xf32>
    %c0_4 = arith.constant 0 : index
    %c0_5 = arith.constant 0 : index
    %18 = vector.load %arg3[%c0_4, %c0_5] : memref<128x96xbf16, #tpu.memory_space<vmem>>, vector<128x96xbf16>
    %cst_6 = arith.constant dense<0.000000e+00> : vector<128x128xf32>
    %19 = tpu.matmul %18, %15, %cst_6 {dimension_numbers = #tpu.dot_dimension_numbers<[1], [0], [0], [1], [0, 0, 1, 1], [], []>} : vector<128x96xbf16>, vector<96x128xbf16>, vector<128x128xf32> -> vector<128x128xf32>
    %20 = vector.shape_cast %19 : vector<128x128xf32> to vector<4x32x128xf32>
    %21 = vector.shape_cast %17 : vector<32x128xf32> to vector<1x32x128xf32>
    %22 = vector.broadcast %21 : vector<1x32x128xf32> to vector<4x32x128xf32>
    %23 = arith.mulf %20, %22 : vector<4x32x128xf32>
    %cst_7 = arith.constant dense<0.000000e+00> : vector<4x128xf32>
    %24 = vector.multi_reduction <add>, %23, %cst_7 [1] : vector<4x32x128xf32> to vector<4x128xf32>
    %c0_8 = arith.constant 0 : index
    %c0_9 = arith.constant 0 : index
    %25 = vector.load %arg4[%c0_8, %c0_9] : memref<4x128xf32, #tpu.memory_space<vmem>>, vector<4x128xf32>
    tpu.vector_store %arg4[%c0_8, %c0_9], %24 {strides = array<i32>} : memref<4x128xf32, #tpu.memory_space<vmem>>, vector<4x128xf32>,
    return
  }
  func.func @transform_0(%arg0: i32) -> (i32, i32) {
    %c0_i32 = arith.constant 0 : i32
    %c0_i32_0 = arith.constant 0 : i32
    return %c0_i32, %arg0 : i32, i32
  }
  func.func @transform_1(%arg0: i32) -> (i32, i32) {
    %c0_i32 = arith.constant 0 : i32
    %c0_i32_0 = arith.constant 0 : i32
    %c0_i32_1 = arith.constant 0 : i32
    return %c0_i32, %c0_i32_0 : i32, i32
  }
  func.func @transform_2(%arg0: i32) -> (i32, i32) {
    %c0_i32 = arith.constant 0 : i32
    %c0_i32_0 = arith.constant 0 : i32
    %c0_i32_1 = arith.constant 0 : i32
    return %c0_i32, %c0_i32_0 : i32, i32
  }
  func.func @transform_3(%arg0: i32) -> (i32, i32) {
    %c0_i32 = arith.constant 0 : i32
    %c0_i32_0 = arith.constant 0 : i32
    return %c0_i32, %arg0 : i32, i32
  }
}

</mosaic_0001>

<bundles_post_ra>
// kernel: tpu_custom_call.1
= control target key start
LH: loop header
LB: loop body
LE: loop exit
PB: predicated region body
PF: predicated region fallthrough
CT: control target
= control target key end

     0   :  { %8 = vsyncpa [#allocation3], 0  ;;  %s1036_s0 = inlined_call_operand.vmem [shape: s32[2,256], index: 0, kind: input, shape index: {}]   ;;  %s1037_s1 = inlined_call_operand.vmem [shape: bf16[32,48], index: 1, kind: input, shape index: {}]   ;;  %s1038_s2 = inlined_call_operand.vmem [shape: bf16[128,96], index: 2, kind: input, shape index: {}]   ;;  %s1039_s3 = inlined_call_operand.hbm [shape: f32[4,256], index: 3, kind: output, shape index: {}]  }
   0x1   :  { %10 = vsyncpa [#allocation3 + $0x1], 0  ;;  %s847_s12 = smov 0   ;;  %s849_s13 = smov 0  }
   0x2   :  { %s851_s14 = smov 0   ;;  %s853_s15 = smov 0  }
   0x3 LB: > { %s868_s16 = sadd.s32 4294967295, %s823_s15   ;;  %s588_s17 = sadd.s32 4294967294, %s823_s15   ;;  %s823_s15 = sphi %s853_s15, %s1049_s15   ;;  %s819_s14 = sphi %s851_s14, %s1048_s14   ;;  %s815_s13 = sphi %s849_s13, %s1047_s13   ;;  %s811_s12 = sphi %s847_s12, %s1046_s12  }
   0x4   : > { %s872_s18 = sadd.s32 1, %s823_s15   ;;  %s91_s19 = sadd.s32 1, %s819_s14 }
   0x5   : > { %s88_s20 = ssub.s32 %s823_s15, %s872_s18  ;;  %p101_p0 = scmp.ne.s32.totalorder %s819_s14, %s815_s13 }
   0x6   : > { %p89_p1 = scmp.eq.s32.totalorder %s88_s20, 0  ;;  %p102_p2 = scmp.eq.s32.totalorder %s868_s16, 1 }
   0x7   : > { %p107_p3 = scmp.ne.s32.totalorder %s815_s13, %s811_s12  ;;  %p108_p4 = scmp.eq.s32.totalorder %s588_s17, 1 }
   0x8   : > { %s883_s21 = scalar_select %p89_p1, %s819_s14, %s91_s19  }
   0x9   : > { %p885_p5 = por %p102_p2, %p101_p0  ;;  %p889_p6 = por %p108_p4, %p107_p3 }
   0xa   : > { %p591_p7 = scmp.ge.s32.totalorder %s823_s15, 1  ;;  %p139_p8 = scmp.lt.s32.totalorder %s823_s15, 3 }
   0xc   : > { %p140_p9 = pnand %p591_p7, %p139_p8 }
   0xd   : > { %p162_p10 = scmp.lt.s32.totalorder (!%p140_p9), %s868_s16, 1  ;;  %s159_s4 = sand.u32 (!%p140_p9), 1, %s815_s13  }
   0xe   : > { %143 = sbr.rel (%p140_p9) target bundleno = 301 (0x12d), region = 32  ;;  %s641_s6 = sshll.u32 (!%p140_p9), %s868_s16, 6 }
   0xf   : > { %s1001_s11 = scalar_lea.hbm (!%p140_p9), %s1039_s3, %s641_s6  ;;  %s516_s17 = scalar_lea.sflag (!%p140_p9), [#allocation3], %s159_s4 }
  0x13   : > { %v169_v0 = vlaneseq  ;;  %v753_v1 = vld [vmem:[%s1037_s1] sm:$0xff]   ;;  %vm217_vm0 = vcmask 392192   ;;  %s163_s26 = scalar_select %p162_p10, %s868_s16, 1  ;;  %v755_v3 = vld [vmem:[%s1038_s2 + $0x10] sm:$0xff]   ;;  %vm329_vm1 = vcmask 785408   ;;  %v754_v12 = vld [vmem:[%s1037_s1 + $0x8] sm:$0xff]  }
  0x14   : > { %669 = vmatprep.mubr.msk.bf16.mxu0 %vm217_vm0, %v753_v1  ;;  %689 = vmatprep.mubr.msk.bf16.mxu1 %vm329_vm1, %v755_v3  ;;  %v825_v9 = vmov 1.0|1.0   ;;  %v759_v13 = vld [vmem:[%s1038_s2] sm:$0xff]   ;;  %v756_v14 = vld [vmem:[%s1038_s2 + $0x18] sm:$0xff]   ;;  %v758_v16 = vld [vmem:[%s1038_s2 + $0x28] sm:$0xff]   ;;  %vm507_vm11 = vcmask 1041409  }
  0x15   : > { %v170_v2 = vshrl.u32 %v169_v0, 7  ;;  %s593_s29 = sshll.u32 %s163_s26, 1  ;;  %v757_v15 = vld [vmem:[%s1038_s2 + $0x20] sm:$0xff]   ;;  %v761_v17 = vld [vmem:[%s1038_s2 + $0x30] sm:$0xff]   ;;  %v760_v18 = vld [vmem:[%s1038_s2 + $0x8] sm:$0xff]   ;;  %vm509_vm12 = vcmask 1042434  }
  0x16   : > { %s165_s5 = scalar_lea.vmem %s1036_s0, %s593_s29  ;;  %v762_v19 = vld [vmem:[%s1038_s2 + $0x38] sm:$0xff]   ;;  %vm511_vm13 = vcmask 1043459   ;;  %s826_s16 = smov [#allocation2]  }
  0x17   : > { %v171_v4 = vadd.s32 8, %v170_v2  ;;  %v172_v5 = vadd.s32 16, %v170_v2  ;;  %v173_v6 = vadd.s32 24, %v170_v2  ;;  %v594_v7 = vld [vmem:[%s165_s5] ss:$0 sm:$0xff]  ;;  %s767_s20 = sshll.u32 %s826_s16, 4  ;;  %s768_s20 = int_to_ptr.vmem [resolvable:$false] %s767_s20 }
  0x18   : > { %v597_v8 = vld [vmem:[%s165_s5 + $0x1] ss:$0 sm:$0xff]  ;;  %vm178_vm2 = vcmp.eq.s32.totalorder %v170_v2, %v594_v7  ;;  %s592_s5 = sshll.u32 %s159_s4, 2  ;;  %s769_s24 = scalar_lea.vmem %s768_s20, 128 }
  0x19   : > { %vm179_vm3 = vcmp.eq.s32.totalorder %v171_v4, %v594_v7  ;;  %vm189_vm4 = vcmp.eq.s32.totalorder %v170_v2, %v597_v8  ;;  %vm190_vm5 = vcmp.eq.s32.totalorder %v171_v4, %v597_v8  ;;  %vm191_vm6 = vcmp.eq.s32.totalorder %v172_v5, %v597_v8  ;;  %s161_s7 = scalar_lea.vmem [#allocation2], %s592_s5 }
  0x1a   : > { %vm192_vm7 = vcmp.eq.s32.totalorder %v173_v6, %v597_v8  ;;  %vm604_vm8 = vmpackc.low %vm179_vm3, %vm178_vm2  ;;  %s529_s8 = sshll.u32 %s161_s7, 4  ;;  %s530_s8 = int_to_ptr.vmem [resolvable:$true] %s529_s8 }
  0x1b   : > { %663 = vmatprep.subr.msk.bf16.mxu0 %vm604_vm8, %v825_v9  ;;  %vm908_vm9 = vmpackc.low %vm192_vm7, %vm191_vm6  ;;  %s763_s19 = scalar_lea.vmem %s530_s8, 64  ;;  %p770_p0 = scmp.lt.s32.totalorder %s530_s8, %s768_s20 }
  0x1c   : > { %vm912_vm10 = vmpackc.low %vm190_vm5, %vm189_vm4  ;;  %701 = vmatprep.subr.msk.bf16.mxu1 %vm908_vm9, %v825_v9  ;;  %664 = vmatpush3.bf16.msk.msra.mxu0 %vm604_vm8, %v825_v9  ;;  %p764_p11 = scmp.ne.s32.totalorder %s530_s8, %s763_s19  ;;  %p771_p1 = scmp.lt.s32.totalorder %s769_s24, %s763_s19 }
  0x1d   : > { %707 = vmatpush3.bf16.msk.msra.mxu1 %vm908_vm9, %v825_v9  ;;  %665 = vmatprep.subr.msk.bf16.mxu0 %vm604_vm8, %v825_v9 }
  0x1e   : > { %702 = vmatprep.subr.msk.bf16.mxu1 %vm912_vm10, %v825_v9  ;;  %p765_p12 = pnand %p764_p11, %p885_p5  ;;  %p772_p2 = por %p771_p1, %p770_p0 }
  0x20   : > { %666 = vmatpush3.bf16.msk.msra.mxu0 %vm604_vm8, %v825_v9  ;;  %p766_p13 = pneg %p765_p12 }
  0x21   : > { %708 = vmatpush3.bf16.msk.msra.mxu1 %vm912_vm10, %v825_v9  ;;  %667 = vmatprep.subr.msk.bf16.mxu0 %vm604_vm8, %v825_v9 }
  0x22   : > { %703 = vmatprep.subr.msk.bf16.mxu1 %vm908_vm9, %v825_v9  ;;  %p773_p3 = pnand %p772_p2, %p766_p13 }
  0x24   : > { %668 = vmatpush3.bf16.msk.msra.mxu0 %vm604_vm8, %v825_v9 }
  0x25   : > { %709 = vmatpush3.bf16.msk.msra.mxu1 %vm908_vm9, %v825_v9  ;;  %673 = vmatprep.subr.msk.bf16.mxu0 %vm908_vm9, %v825_v9 }
  0x26   : > { %704 = vmatprep.subr.msk.bf16.mxu1 %vm912_vm10, %v825_v9 }
  0x27   : > { %670 = vmatmul.mubr.msk.bf16.vlgmr.msra.gmra.mxu0 %vm217_vm0, %v754_v12 }
  0x28   : > { %674 = vmatpush3.bf16.msk.msra.mxu0 %vm908_vm9, %v825_v9  ;;  %685 = vmatprep.mubr.msk.bf16.mxu0 %vm329_vm1, %v759_v13 }
  0x29   : > { %710 = vmatpush3.bf16.msk.msra.mxu1 %vm912_vm10, %v825_v9  ;;  %675 = vmatprep.subr.msk.bf16.mxu0 %vm912_vm10, %v825_v9 }
  0x2a   : > { %705 = vmatprep.subr.msk.bf16.mxu1 %vm908_vm9, %v825_v9 }
  0x2c   : > { %676 = vmatpush3.bf16.msk.msra.mxu0 %vm912_vm10, %v825_v9 }
  0x2d   : > { %711 = vmatpush3.bf16.msk.msra.mxu1 %vm908_vm9, %v825_v9  ;;  %677 = vmatprep.subr.msk.bf16.mxu0 %vm908_vm9, %v825_v9 }
  0x2e   : > { %706 = vmatprep.subr.msk.bf16.mxu1 %vm912_vm10, %v825_v9 }
  0x30   : > { %678 = vmatpush3.bf16.msk.msra.mxu0 %vm908_vm9, %v825_v9 }
  0x31   : > { %712 = vmatpush3.bf16.msk.msra.mxu1 %vm912_vm10, %v825_v9  ;;  %679 = vmatprep.subr.msk.bf16.mxu0 %vm912_vm10, %v825_v9 }
  0x34   : > { %690 = vmatmul.mubr.msk.bf16.vlgmr.msra.gmra.mxu1 %vm329_vm1, %v756_v14  ;;  %680 = vmatpush3.bf16.msk.msra.mxu0 %vm912_vm10, %v825_v9 }
  0x35   : > { %681 = vmatprep.subr.msk.bf16.mxu0 %vm908_vm9, %v825_v9  ;;  %693 = vmatprep.mubr.msk.bf16.mxu1 %vm329_vm1, %v757_v15 }
  0x38   : > { %682 = vmatpush3.bf16.msk.msra.mxu0 %vm908_vm9, %v825_v9 }
  0x39   : > { %683 = vmatprep.subr.msk.bf16.mxu0 %vm912_vm10, %v825_v9 }
  0x3c   : > { %694 = vmatmul.mubr.msk.bf16.gmra.mxu1 %vm329_vm1, %v758_v16  ;;  %684 = vmatpush3.bf16.msk.msra.mxu0 %vm912_vm10, %v825_v9 }
  0x3d   : > { %697 = vmatprep.mubr.msk.bf16.mxu1 %vm329_vm1, %v761_v17 }
  0x3f   : > { %686 = vmatmul.mubr.msk.bf16.vlgmr.msra.gmra.mxu0 %vm329_vm1, %v760_v18 }
  0x44   : > { %698 = vmatmul.mubr.msk.bf16.gmra.mxu1 %vm329_vm1, %v762_v19 }
  0xe7   : > { %v671_v20 = vpop.f32.mrf.mxu0 }
  0xe9   : > { %v258_v21 = vpop.f32.mrf.mxu0 }
  0xeb   : > { %v672_v23 = vpop.f32.mrf.mxu0 }
  0xed   : > { %v261_v26 = vpop.f32.mrf.mxu0 }
  0xf4   : > { %v691_v22 = vpop.f32.mrf.mxu1 }
  0xf5   : > { %v457_v31 = vmul.f32 %v691_v22, %v671_v20 }
  0xf6   : > { %v404_v24 = vpop.f32.mrf.mxu1 }
  0xf7   : > { %v455_v28 = vmul.f32 %v404_v24, %v258_v21 }
  0xf8   : > { %v692_v25 = vpop.f32.mrf.mxu1 }
  0xf9   : > { %v458_v34 = vmul.f32 %v692_v25, %v672_v23 }
  0xfa   : > { %v407_v27 = vpop.f32.mrf.mxu1 }
  0xfb   : > { %v456_v29 = vmul.f32 %v407_v27, %v261_v26 }
  0xfc   : > { %v695_v30 = vpop.f32.mrf.mxu1 }
  0xfd   : > { %v476_v32 = vadd.f32 %v456_v29, %v455_v28  ;;  %v461_v46 = vmul.f32 %v695_v30, %v671_v20 }
  0xfe   : > { %v420_v33 = vpop.f32.mrf.mxu1 }
  0xff   : > { %v477_v35 = vadd.f32 %v476_v32, %v457_v31  ;;  %v687_v36 = vpop.f32.mrf.mxu0  ;;  %v459_v41 = vmul.f32 %v420_v33, %v258_v21 }
 0x100   : > { %v696_v37 = vpop.f32.mrf.mxu1  ;;  %v453_v54 = vmul.f32 %v687_v36, %v671_v20 }
 0x101   : > { %v478_v38 = vadd.f32 %v477_v35, %v458_v34  ;;  %v388_v39 = vpop.f32.mrf.mxu0  ;;  %v462_v52 = vmul.f32 %v696_v37, %v672_v23 }
 0x102   : > { %v423_v40 = vpop.f32.mrf.mxu1  ;;  %v451_v49 = vmul.f32 %v388_v39, %v258_v21 }
 0x103   : > { %v460_v42 = vmul.f32 %v423_v40, %v261_v26  ;;  %v688_v43 = vpop.f32.mrf.mxu0  ;;  %v479_v45 = vrot.slane %v478_v38, 4 }
 0x104   : > { %v699_v44 = vpop.f32.mrf.mxu1  ;;  %v454_v59 = vmul.f32 %v688_v43, %v672_v23 }
 0x105   : > { %v485_v47 = vadd.f32 %v460_v42, %v459_v41  ;;  %v391_v48 = vpop.f32.mrf.mxu0  ;;  %v480_v57 = vadd.f32 %v479_v45, %v478_v38  ;;  %v465_v4 = vmul.f32 %v699_v44, %v671_v20 }
 0x106   : > { %v452_v50 = vmul.f32 %v391_v48, %v261_v26  ;;  %v436_v51 = vpop.f32.mrf.mxu1 }
 0x107   : > { %v486_v53 = vadd.f32 %v485_v47, %v461_v46  ;;  %v463_v63 = vmul.f32 %v436_v51, %v258_v21  ;;  %v481_v2 = vrot.slane %v480_v57, 2 }
 0x108   : > { %v467_v55 = vadd.f32 %v452_v50, %v451_v49  ;;  %v700_v56 = vpop.f32.mrf.mxu1 }
 0x109   : > { %v487_v58 = vadd.f32 %v486_v53, %v462_v52  ;;  %v466_v7 = vmul.f32 %v700_v56, %v672_v23  ;;  %v482_v11 = vadd.f32 %v481_v2, %v480_v57 }
 0x10a   : > { %v468_v60 = vadd.f32 %v467_v55, %v453_v54  ;;  %v439_v61 = vpop.f32.mrf.mxu1 }
 0x10b   : > { %v488_v62 = vrot.slane %v487_v58, 4  ;;  %v464_v0 = vmul.f32 %v439_v61, %v261_v26  ;;  %v483_v17 = vrot.slane %v482_v11, 1 }
 0x10c   : > { %v469_v1 = vadd.f32 %v468_v60, %v454_v59 }
 0x10d   : > { %v489_v3 = vadd.f32 %v488_v62, %v487_v58  ;;  %v494_v5 = vadd.f32 %v464_v0, %v463_v63  ;;  %v484_v23 = vadd.f32 %v483_v17, %v482_v11 }
 0x10e   : > { %v470_v6 = vrot.slane %v469_v1, 4 }
 0x10f   : > { %v495_v8 = vadd.f32 %v494_v5, %v465_v4  ;;  %v490_v9 = vrot.slane %v489_v3, 2 }
 0x110   : > { %v471_v10 = vadd.f32 %v470_v6, %v469_v1 }
 0x111   : > { %v496_v12 = vadd.f32 %v495_v8, %v466_v7  ;;  %v491_v15 = vadd.f32 %v490_v9, %v489_v3 }
 0x112   : > { %v472_v13 = vrot.slane %v471_v10, 2 }
 0x113   : > { %v497_v14 = vrot.slane %v496_v12, 4  ;;  %v492_v20 = vrot.slane %v491_v15, 1 }
 0x114   : > { %v473_v16 = vadd.f32 %v472_v13, %v471_v10 }
 0x115   : > { %v498_v18 = vadd.f32 %v497_v14, %v496_v12  ;;  %v493_v27 = vadd.f32 %v492_v20, %v491_v15 }
 0x116   : > { %v474_v19 = vrot.slane %v473_v16, 1 }
 0x117   : > { %v499_v21 = vrot.slane %v498_v18, 2 }
 0x118   : > { %v475_v22 = vadd.f32 %v474_v19, %v473_v16 }
 0x119   : > { %v500_v24 = vadd.f32 %v499_v21, %v498_v18 }
 0x11a   : > { %v508_v26 = vsel %vm507_vm11, %v484_v23, %v475_v22 }
 0x11b   : > { %v501_v25 = vrot.slane %v500_v24, 1  ;;  %v510_v29 = vsel %vm509_vm12, %v493_v27, %v508_v26 }
 0x11d   : > { %v502_v28 = vadd.f32 %v501_v25, %v500_v24 }
 0x11f   : > { %v512_v30 = vsel %vm511_vm13, %v502_v28, %v510_v29 }
 0x120   : > { %514 = vst [vmem:[%s161_s7] sm:$0xf] %v512_v30 }
 0x121   : > { %776 = shalt.err (!%p773_p3)
}
 0x122   : > { %s777_s25 = scalar_lea.hbm %s1001_s11, 64  ;;  %s781_s28 = scalar_lea.hbm %s1039_s3, 128 }
 0x123   : > { %p778_p4 = scmp.ne.s32.totalorder %s1001_s11, %s777_s25  ;;  %p782_p9 = scmp.lt.s32.totalorder %s1001_s11, %s1039_s3 }
 0x124   : > { %p783_p10 = scmp.lt.s32.totalorder %s781_s28, %s777_s25 }
 0x125   : > { %p779_p7 = pnand %p778_p4, %p885_p5 }
 0x126   : > { %p784_p11 = por %p783_p10, %p782_p9 }
 0x127   : > { %p780_p8 = pneg %p779_p7 }
 0x129   : > { %p785_p12 = pnand %p784_p11, %p780_p8 }
 0x12b   : > { %788 = shalt.err (!%p785_p12)
}
 0x12c   : > { %713 = dma.vmem_to_hbm [thread:$0]  (%p885_p5), %s530_s8, 64, %s1001_s11, %s516_s17  }
 0x12d PF: > { %p719_p13 = scmp.ge.s32.totalorder %s823_s15, 2  ;;  %s541_s4 = sand.u32 1, %s811_s12  }
 0x12e   : > { %s542_s5 = scalar_lea.sflag [#allocation3], %s541_s4 }
 0x12f   : > { %p716_p0 = pnand %p719_p13, %p889_p6 }
 0x131   : > { %p717_p1 = pneg %p716_p0 }
 0x133   : > { %806 = dma.done.wait (%p717_p1), %s542_s5, 64  }
 0x134   : > { %808 = vsyncadd (%p717_p1), %s542_s5, 4294967232  ;;  %p13_p2 = scmp.ge.s32.totalorder %s872_s18, 4   ;;  %s1046_s12 = smov %s815_s13 }
 0x135   : > { %s1047_s13 = smov %s819_s14  ;;  %s1048_s14 = smov %s883_s21 }
 0x136   : > { %s1049_s15 = smov %s872_s18  ;;  %15 = sbr.rel (!%p13_p2) target bundleno = 3 (0x3), region = 67 }
 0x13b   :  { %547 = vsyncpa [#allocation3], 1 }
 0x13c   :  { %549 = vsyncpa [#allocation3 + $0x1], 1 }

</bundles_post_ra>
